<compile_context>
chip_gen: v7x
topology: tpu7x:2x2x1
jax: 0.10.0
libtpu: 0.0.40
codegen_flags: <defaults>
</compile_context>

<pallas_src>
import jax
import jax.numpy as jnp
from jax.experimental import pallas as pl
from jax.experimental.pallas import tpu as pltpu


def _logreg_kernel(params_ref, x_ref, o_ref):
    # params_ref: SMEM (3,) f32 -> [w0, w1, b]   (scalar prefetch)
    # x_ref:      VMEM (2, R, 128) f32           (feature-major, lane/sublane dense)
    # o_ref:      VMEM (R, 128) f32
    w0 = params_ref[0]
    w1 = params_ref[1]
    b = params_ref[2]

    # Linear(2, 1) on the VPU: two FMAs per lane, no MXU involvement.
    z = x_ref[0] * w0 + x_ref[1] * w1 + b            # (R, 128)

    # Exact sigmoid via a single tanh (one EUP op per element).
    o_ref[...] = (0.5 * jnp.tanh(0.5 * z) + 0.5).astype(o_ref.dtype)


def _cdiv(a, b):
    return (a + b - 1) // b


def _round_up(v, m):
    return _cdiv(v, m) * m


def logistic_regression_forward(x, weight, bias, *, max_rows_per_tile=2048):
    """sigmoid(x @ weight.T + bias).

    x:      [N, 2] float32
    weight: [1, 2] float32 (torch nn.Linear [out, in] layout)
    bias:   [1]    float32
    returns [N, 1] float32
    """
    n = x.shape[0]
    assert x.shape[1] == 2, "LogisticRegression expects 2 input features"

    # Rows of 128 lanes; tile over rows in multiples of 8 sublanes so blocks
    # are (8,128)-aligned.  Padding is bounded to < 8 rows per problem
    # (not per tile), so wasted work stays tiny for any N.
    rows_total = _cdiv(n, 128)
    num_tiles = max(1, _cdiv(rows_total, max_rows_per_tile))
    rows_per_tile = _round_up(_cdiv(rows_total, num_tiles), 8)
    rows_pad = num_tiles * rows_per_tile
    n_pad = rows_pad * 128

    # Feature-major, lane-dense, sublane-dense input: (2, rows_pad, 128).
    # Padded tail elements compute sigmoid(b) and are sliced off below.
    xt = jnp.zeros((2, n_pad), dtype=jnp.float32).at[:, :n].set(
        x.astype(jnp.float32).T).reshape(2, rows_pad, 128)

    # The 3 parameters live in SMEM via scalar prefetch (no VMEM tiles/DMAs).
    params = jnp.concatenate(
        [weight.reshape(-1).astype(jnp.float32),
         bias.reshape(-1).astype(jnp.float32)])      # [w0, w1, b]

    out = pl.pallas_call(
        _logreg_kernel,
        out_shape=jax.ShapeDtypeStruct((rows_pad, 128), jnp.float32),
        grid_spec=pltpu.PrefetchScalarGridSpec(
            num_scalar_prefetch=1,
            grid=(num_tiles,),
            in_specs=[
                # (2, R, 128): leading dim equals full extent, (R,128) is
                # (8,128)-aligned and dense.
                pl.BlockSpec((2, rows_per_tile, 128), lambda i, p: (0, i, 0)),
            ],
            out_specs=pl.BlockSpec((rows_per_tile, 128), lambda i, p: (i, 0)),
        ),
        compiler_params=pltpu.CompilerParams(
            dimension_semantics=("parallel",),
            vmem_limit_bytes=32 * 1024 * 1024,
        ),
    )(params, xt)

    return out.reshape(-1)[:n].reshape(n, 1)


if __name__ == "__main__":
    key = jax.random.PRNGKey(0)
    kx, kw, kb = jax.random.split(key, 3)

    # Small batch of 2-feature inputs, matching nn.Linear(2, 1).
    batch = 8
    x = jax.random.normal(kx, (batch, 2), dtype=jnp.float32)

    # Deterministic params with nn.Linear(2, 1) shapes and default-style init:
    #   weight: [out_features=1, in_features=2], bias: [1]
    bound = 1.0 / jnp.sqrt(2.0)
    weight = jax.random.uniform(kw, (1, 2), minval=-bound, maxval=bound,
                                dtype=jnp.float32)
    bias = jax.random.uniform(kb, (1,), minval=-bound, maxval=bound,
                              dtype=jnp.float32)

    out = logistic_regression_forward(x, weight, bias)
    out = jax.block_until_ready(out)

    # Pure-JAX reference check (exact sigmoid -> tight tolerance).
    ref = jax.nn.sigmoid(x @ weight.T + bias)
    assert out.shape == (batch, 1)
    assert jnp.allclose(out, ref, atol=1e-5, rtol=1e-5), "mismatch vs reference"

    print("KERNEL_OK")
</pallas_src>

<mosaic_0001>
module attributes {stable_mosaic.version = 11 : i64} {
  func.func @_logreg_kernel(%arg0: i32, %arg1: memref<3xf32, #tpu.memory_space<smem>>, %arg2: memref<2x8x128xf32, #tpu.memory_space<vmem>>, %arg3: memref<8x128xf32, #tpu.memory_space<vmem>>) attributes {dimension_semantics = [#tpu.dimension_semantics<parallel>], iteration_bounds = array<i64: 1>, scalar_prefetch = 1 : i64, scratch_operands = 0 : i64, tpu.core_type = #tpu.core_type<tc>, window_params = [{transform_indices = @transform_0, window_bounds = array<i64: 2, 8, 128>}, {transform_indices = @transform_1, window_bounds = array<i64: 8, 128>}]} {
    %c0 = arith.constant 0 : index
    %0 = memref.load %arg1[%c0] : memref<3xf32, #tpu.memory_space<smem>>
    %c1 = arith.constant 1 : index
    %1 = memref.load %arg1[%c1] : memref<3xf32, #tpu.memory_space<smem>>
    %c2 = arith.constant 2 : index
    %2 = memref.load %arg1[%c2] : memref<3xf32, #tpu.memory_space<smem>>
    %c0_0 = arith.constant 0 : index
    %c0_1 = arith.constant 0 : index
    %c0_2 = arith.constant 0 : index
    %3 = vector.load %arg2[%c0_0, %c0_1, %c0_2] : memref<2x8x128xf32, #tpu.memory_space<vmem>>, vector<1x8x128xf32>
    %4 = vector.shape_cast %3 : vector<1x8x128xf32> to vector<8x128xf32>
    %5 = vector.broadcast %0 : f32 to vector<8x128xf32>
    %6 = arith.mulf %4, %5 : vector<8x128xf32>
    %c1_3 = arith.constant 1 : index
    %c0_4 = arith.constant 0 : index
    %c0_5 = arith.constant 0 : index
    %7 = vector.load %arg2[%c1_3, %c0_4, %c0_5] : memref<2x8x128xf32, #tpu.memory_space<vmem>>, vector<1x8x128xf32>
    %8 = vector.shape_cast %7 : vector<1x8x128xf32> to vector<8x128xf32>
    %9 = vector.broadcast %1 : f32 to vector<8x128xf32>
    %10 = arith.mulf %8, %9 : vector<8x128xf32>
    %11 = arith.addf %6, %10 : vector<8x128xf32>
    %12 = vector.broadcast %2 : f32 to vector<8x128xf32>
    %13 = arith.addf %11, %12 : vector<8x128xf32>
    %cst = arith.constant 5.000000e-01 : f32
    %14 = vector.broadcast %cst : f32 to vector<8x128xf32>
    %15 = arith.mulf %14, %13 : vector<8x128xf32>
    %16 = math.tanh %15 : vector<8x128xf32>
    %cst_6 = arith.constant 5.000000e-01 : f32
    %17 = vector.broadcast %cst_6 : f32 to vector<8x128xf32>
    %18 = arith.mulf %17, %16 : vector<8x128xf32>
    %cst_7 = arith.constant 5.000000e-01 : f32
    %19 = vector.broadcast %cst_7 : f32 to vector<8x128xf32>
    %20 = arith.addf %18, %19 : vector<8x128xf32>
    %c0_8 = arith.constant 0 : index
    %c0_9 = arith.constant 0 : index
    %21 = vector.load %arg3[%c0_8, %c0_9] : memref<8x128xf32, #tpu.memory_space<vmem>>, vector<8x128xf32>
    tpu.vector_store %arg3[%c0_8, %c0_9], %20 {strides = array<i32>} : memref<8x128xf32, #tpu.memory_space<vmem>>, vector<8x128xf32>,
    return
  }
  func.func @transform_0(%arg0: i32, %arg1: memref<3xf32, #tpu.memory_space<smem>>) -> (i32, i32, i32) {
    %c0_i32 = arith.constant 0 : i32
    %c0_i32_0 = arith.constant 0 : i32
    %c0_i32_1 = arith.constant 0 : i32
    return %c0_i32, %arg0, %c0_i32_0 : i32, i32, i32
  }
  func.func @transform_1(%arg0: i32, %arg1: memref<3xf32, #tpu.memory_space<smem>>) -> (i32, i32) {
    %c0_i32 = arith.constant 0 : i32
    %c0_i32_0 = arith.constant 0 : i32
    return %arg0, %c0_i32 : i32, i32
  }
}

</mosaic_0001>

<bundles_post_ra>
// kernel: tpu_custom_call.1
= control target key start
LH: loop header
LB: loop body
LE: loop exit
PB: predicated region body
PF: predicated region fallthrough
CT: control target
= control target key end

     0   :  { %s186_s0 = inlined_call_operand.hbm [shape: f32[3], index: 0, kind: input, shape index: {}]   ;;  %s187_s1 = inlined_call_operand.hbm [shape: f32[2,8,128], index: 1, kind: input, shape index: {}]   ;;  %s188_s2 = inlined_call_operand.hbm [shape: f32[8,128], index: 2, kind: output, shape index: {}]  }
   0x1   :  { %s70_s11 = scalar_lea.hbm %s186_s0, 16 }
   0x2   :  { %p71_p0 = scmp.ne.s32.totalorder %s186_s0, %s70_s11  ;;  %p74_p1 = scmp.lt.u32.totalorder %s70_s11, %s186_s0 }
   0x4   :  { %p76_p2 = pnand %p74_p1, %p71_p0 }
   0x6   :  { %79 = shalt.err (!%p76_p2)  }
   0x7   :  { %s130_s16 = smov [#allocation3]  }
   0x8   :  { %8 = dma.hbm_to_smem %s186_s0, 16, %s130_s16, [#allocation2] }
   0x9   :  { %124 = dma.done.wait [#allocation2], 16 }
   0xa   :  { %125 = vsyncadd [#allocation2], 4294967280 }
   0xb   :  { %10 = sfence }
   0xc   :  { %11 = vsyncpa [#allocation5], 0 }
   0xd   :  { %12 = vsyncpa [#allocation6], 0  ;;  %s131_s19 = smov [#allocation4]   ;;  %s80_s23 = scalar_lea.hbm %s187_s1, 256 }
   0xe   :  { %s18_s20 = sshll.u32 %s131_s19, 4  ;;  %p81_p3 = scmp.ne.s32.totalorder %s187_s1, %s80_s23  ;;  %s19_s20 = int_to_ptr.vmem [resolvable:$true] %s18_s20 }
   0xf   :  { %p84_p4 = scmp.lt.u32.totalorder %s80_s23, %s187_s1 }
  0x11   :  { %p86_p5 = pnand %p84_p4, %p81_p3 }
  0x13   :  { %89 = shalt.err (!%p86_p5)
}
  0x14   :  { %s90_s0 = scalar_lea.vmem %s19_s20, 256  ;;  %p95_p7 = scmp.lt.s32.totalorder %s19_s20, %s19_s20 }
  0x15   :  { %p91_p6 = scmp.ne.s32.totalorder %s19_s20, %s90_s0  ;;  %p96_p8 = scmp.lt.s32.totalorder %s90_s0, %s90_s0 }
  0x17   :  { %p97_p9 = por %p96_p8, %p95_p7 }
  0x19   :  { %p98_p10 = pnand %p97_p9, %p91_p6 }
  0x1b   :  { %101 = shalt.err (!%p98_p10)
}
  0x1c   :  { %s132_s28 = smov 128   ;;  %s133_s29 = smov 8  }
  0x1d   :  { %24 = dma.hbm_to_vmem [thread:$0]  %s187_s1, 256, %s19_s20, [#allocation5], %s132_s28, %s132_s28, %s133_s29  }
  0x1e   :  { %126 = dma.done.wait [#allocation5], 256  }
  0x1f   :  { %127 = vsyncadd [#allocation5], 4294967040  ;;  %s28_s4 = sld [smem:[#allocation3]]  ;;  %s61_s5 = sld [smem:[#allocation3 + $0x1]]  ;;  %v31_v0 = vld [vmem:[#allocation4] sm:$0xff]  ;;  %v35_v2 = vld [vmem:[#allocation4 + $0x8] sm:$0xff] }
  0x20   :  { %s62_s6 = sld [smem:[#allocation3 + $0x2]]  ;;  %s134_s7 = smov [#allocation7]  }
  0x21   :  { %s52_s8 = sshll.u32 %s134_s7, 4  ;;  %s53_s8 = int_to_ptr.vmem [resolvable:$true] %s52_s8 }
  0x22   :  { %s102_s1 = scalar_lea.vmem %s53_s8, 128  ;;  %p107_p12 = scmp.lt.s32.totalorder %s53_s8, %s53_s8 }
  0x23   :  { %p103_p11 = scmp.ne.s32.totalorder %s53_s8, %s102_s1  ;;  %p108_p13 = scmp.lt.s32.totalorder %s102_s1, %s102_s1 }
  0x25   :  { %v32_v1 = vstv %s28_s4  ;;  %v36_v3 = vstv %s61_s5  ;;  %p109_p0 = por %p108_p13, %p107_p12 }
  0x26   :  { %v33_v4 = vmul.f32 %v32_v1, %v31_v0  ;;  %v37_v5 = vmul.f32 %v36_v3, %v35_v2  ;;  %v39_v6 = vstv %s62_s6 }
  0x27   :  { %p110_p1 = pnand %p109_p0, %p103_p11 }
  0x28   :  { %v38_v7 = vadd.f32 %v37_v5, %v33_v4 }
  0x2a   :  { %v40_v8 = vadd.f32 %v39_v6, %v38_v7 }
  0x2c   :  { %v41_v9 = vmul.f32 0.5, %v40_v8 }
  0x2e   :  { %68 = vtanh.f32 %v41_v9 }
  0x38   :  { %v69_v10 = vpop.eup %68 }
  0x39   :  { %v43_v11 = vmul.f32 0.5, %v69_v10 }
  0x3b   :  { %v44_v12 = vadd.f32 0.5, %v43_v11 }
  0x3d   :  { %45 = vst [vmem:[#allocation7] sm:$0xff] %v44_v12 }
  0x3e   :  { %113 = shalt.err (!%p110_p1)
}
  0x3f   :  { %s114_s11 = scalar_lea.hbm %s188_s2, 128 }
  0x40   :  { %p115_p2 = scmp.ne.s32.totalorder %s188_s2, %s114_s11  ;;  %p118_p3 = scmp.lt.u32.totalorder %s114_s11, %s188_s2 }
  0x42   :  { %p120_p4 = pnand %p118_p3, %p115_p2 }
  0x44   :  { %123 = shalt.err (!%p120_p4)
}
  0x45   :  { %55 = dma.vmem_to_hbm [thread:$0]  %s53_s8, 128, %s188_s2, [#allocation6]  }
  0x46   :  { %128 = dma.done.wait [#allocation6], 128  }
  0x47   :  { %129 = vsyncadd [#allocation6], 4294967168 }
  0x48   :  { %59 = vsyncpa [#allocation5], 1 }
  0x49   :  { %60 = vsyncpa [#allocation6], 1 }

</bundles_post_ra>
